<compile_context>
chip_gen: v7x
topology: tpu7x:2x2x1
jax: 0.10.0
libtpu: 0.0.40
codegen_flags: <defaults>
</compile_context>

<pallas_src>
import jax
import jax.numpy as jnp
from jax.experimental import pallas as pl
from jax.experimental.pallas import tpu as pltpu


def _stiffness_loss_kernel(k_ref, u_ref, q_ref, out_ref):
    """k_ref: (tm, n)  u_ref: (1, n)  q_ref: (tm, 1)  out_ref: (1, 1, 1).

    Emits the UNscaled partial  sum_i (k[i, :] @ u - q[i])^2  for this row
    block into its own output slot (scale^2 / n is applied in the wrapper).
    Tail rows past n (last block when tm does not divide n) are masked out.
    """
    tm = k_ref.shape[0]
    n = k_ref.shape[1]          # square matrix: true row count == column count

    # VPU multiply + lane reduce matvec (no MXU, no padded (n,1) RHS).
    q_pred = jnp.sum(k_ref[...] * u_ref[...], axis=-1, keepdims=True)  # (tm, 1)
    diff = q_pred - q_ref[...]                                         # (tm, 1)

    if n % tm != 0:
        # Mask rows that fall past the end of the (unpadded) array on the last
        # block.  Static check, so divisible shapes keep the clean path.
        row = (jax.lax.broadcasted_iota(jnp.int32, (tm, 1), 0)
               + pl.program_id(0) * tm)
        diff = jnp.where(row < n, diff, 0.0)

    ssq = jnp.sum(diff * diff, axis=0, keepdims=True)                  # (1, 1)
    out_ref[...] = ssq.reshape(1, 1, 1)


def _vmem_budget():
    """Generation-aware VMEM budgets: (k-stream budget, vmem_limit cap)."""
    cap = 64 << 20  # conservative default (v7x per-TC VMEM)
    try:
        info = pltpu.get_tpu_info()
        cap = int(getattr(info, "vmem_capacity_bytes", cap)) or cap
    except Exception:
        pass
    return int(0.45 * cap), int(0.75 * cap)


def _choose_tm(n, tm_req, k_bytes_budget):
    """Row tile: largest multiple of 8 <= tm_req whose double-buffered (tm, n)
    f32 block fits the budget; prefer an even grid (>= 2) for v7x megacore."""
    row_bytes = 4 * n
    n_pad = ((n + 7) // 8) * 8
    tm_cap = max(8, (k_bytes_budget // (2 * row_bytes)) // 8 * 8)
    tm = max(8, (min(tm_req, n_pad, tm_cap) // 8) * 8)
    grid = pl.cdiv(n, tm)

    if grid == 1 and n > 8:
        # Split into two blocks so the "parallel" axis can use both cores on
        # v7x; on single-TC chips this costs one ~0.35 us pipeline step.
        tm = max(8, ((pl.cdiv(n, 2) + 7) // 8) * 8)
        grid = pl.cdiv(n, tm)
    elif grid > 1 and grid % 2 == 1:
        # Search a modest window below tm for a tile giving an even grid.
        t = tm - 8
        floor = max(8, (3 * tm) // 4)
        while t >= floor:
            if pl.cdiv(n, t) % 2 == 0:
                tm, grid = t, pl.cdiv(n, t)
                break
            t -= 8
    return tm, grid


def stiffness_to_load_loss(k, u, q, *, scale=1e-6, tm=512):
    if scale is None:
        scale = 1.0
    n = k.shape[0]
    assert k.shape == (n, n) and u.shape == (n, 1) and q.shape == (n, 1)

    k_budget, vmem_cap = _vmem_budget()
    tm, grid = _choose_tm(n, tm, k_budget)

    u_row = u.reshape(1, n)  # lane-dense RHS (avoids 128x lane padding of (n,1))

    block_bytes = tm * n * 4
    # Deepen k buffering only when blocks are small (DMA issue latency visible)
    # and the extra buffer is trivially cheap in VMEM.
    k_buffers = 3 if (block_bytes < (2 << 20)
                      and 3 * block_bytes < k_budget) else 2

    n128 = ((n + 127) // 128) * 128
    needed = (k_buffers * block_bytes          # k stream buffers
              + 2 * 8 * n128 * 4               # resident u row (padded)
              + 2 * tm * 128 * 4               # q slices (lane padded)
              + (2 << 20))                     # headroom / internal scratch
    vmem_limit = int(min(vmem_cap, max(needed + (4 << 20), 32 << 20)))

    cost = pl.CostEstimate(flops=2 * n * n, transcendentals=0,
                           bytes_accessed=4 * (n * n + 2 * n) + 4 * grid)

    def run(buffer_count):
        if buffer_count == 2:
            k_spec = pl.BlockSpec((tm, n), lambda i: (i, 0))
        else:
            k_spec = pl.BlockSpec((tm, n), lambda i: (i, 0),
                                  pipeline_mode=pl.Buffered(buffer_count))
        return pl.pallas_call(
            _stiffness_loss_kernel,
            out_shape=jax.ShapeDtypeStruct((grid, 1, 1), jnp.float32),
            grid_spec=pltpu.PrefetchScalarGridSpec(
                num_scalar_prefetch=0,
                grid=(grid,),
                in_specs=[
                    k_spec,                                    # k row block
                    pl.BlockSpec((1, n), lambda i: (0, 0)),    # u row, resident
                    pl.BlockSpec((tm, 1), lambda i: (i, 0)),   # matching q slice
                ],
                out_specs=pl.BlockSpec((1, 1, 1), lambda i: (i, 0, 0)),
            ),
            compiler_params=pltpu.CompilerParams(
                dimension_semantics=("parallel",),
                vmem_limit_bytes=vmem_limit,
            ),
            cost_estimate=cost,
        )(k, u_row, q)

    if k_buffers == 2:
        partials = run(2)
    else:
        try:
            partials = run(k_buffers)
        except Exception:
            partials = run(2)

    # Hoisted scale: mean((s*k @ u - s*q)^2) == s^2 / n * sum((k @ u - q)^2)
    return jnp.sum(partials) * jnp.float32(scale * scale) / jnp.float32(n)


def stiffness_to_load_loss_ref(k, u, q, scale=1e-6):
    if scale is None:
        scale = 1.0
    ks = k * scale
    qs = q * scale
    q_pred = jnp.matmul(ks, u, precision=jax.lax.Precision.HIGHEST)
    return jnp.mean((q_pred - qs) ** 2)


if __name__ == "__main__":
    n = 128
    key = jax.random.PRNGKey(0)
    kk, ku, kq = jax.random.split(key, 3)
    k = jax.random.normal(kk, (n, n), dtype=jnp.float32)
    u = jax.random.normal(ku, (n, 1), dtype=jnp.float32)
    q = jax.random.normal(kq, (n, 1), dtype=jnp.float32)

    loss = stiffness_to_load_loss(k, u, q, scale=1e-6)
    loss = jax.block_until_ready(loss)

    ref = stiffness_to_load_loss_ref(k, u, q, scale=1e-6)
    assert jnp.allclose(loss, ref, rtol=1e-4, atol=0.0), (loss, ref)
    print("KERNEL_OK")
</pallas_src>

<mosaic_0001>
module attributes {stable_mosaic.version = 11 : i64} {
  func.func @_stiffness_loss_kernel(%arg0: i32, %arg1: memref<64x128xf32, #tpu.memory_space<vmem>>, %arg2: memref<1x128xf32, #tpu.memory_space<vmem>>, %arg3: memref<64x1xf32, #tpu.memory_space<vmem>>, %arg4: memref<1x1x1xf32, #tpu.memory_space<vmem>>) attributes {dimension_semantics = [#tpu.dimension_semantics<parallel>], iteration_bounds = array<i64: 2>, scalar_prefetch = 0 : i64, scratch_operands = 0 : i64, tpu.core_type = #tpu.core_type<tc>, window_params = [{transform_indices = @transform_0, window_bounds = array<i64: 64, 128>}, {pipeline_mode = #tpu.pipeline_mode<synchronous>, transform_indices = @transform_1, window_bounds = array<i64: 1, 128>}, {transform_indices = @transform_2, window_bounds = array<i64: 64, 1>}, {transform_indices = @transform_3, window_bounds = array<i64: 1, 1, 1>}]} {
    %c0 = arith.constant 0 : index
    %c0_0 = arith.constant 0 : index
    %0 = vector.load %arg1[%c0, %c0_0] : memref<64x128xf32, #tpu.memory_space<vmem>>, vector<64x128xf32>
    %c0_1 = arith.constant 0 : index
    %c0_2 = arith.constant 0 : index
    %1 = vector.load %arg2[%c0_1, %c0_2] : memref<1x128xf32, #tpu.memory_space<vmem>>, vector<1x128xf32>
    %2 = vector.broadcast %1 : vector<1x128xf32> to vector<64x128xf32>
    %3 = arith.mulf %0, %2 : vector<64x128xf32>
    %cst = arith.constant dense<0.000000e+00> : vector<64xf32>
    %4 = vector.multi_reduction <add>, %3, %cst [1] : vector<64x128xf32> to vector<64xf32>
    %5 = vector.shape_cast %4 : vector<64xf32> to vector<64x1xf32>
    %c0_3 = arith.constant 0 : index
    %c0_4 = arith.constant 0 : index
    %6 = vector.load %arg3[%c0_3, %c0_4] : memref<64x1xf32, #tpu.memory_space<vmem>>, vector<64x1xf32>
    %7 = arith.subf %5, %6 : vector<64x1xf32>
    %8 = arith.mulf %7, %7 : vector<64x1xf32>
    %cst_5 = arith.constant dense<0.000000e+00> : vector<1xf32>
    %9 = vector.multi_reduction <add>, %8, %cst_5 [0] : vector<64x1xf32> to vector<1xf32>
    %10 = vector.shape_cast %9 : vector<1xf32> to vector<1x1xf32>
    %11 = vector.shape_cast %10 : vector<1x1xf32> to vector<1x1x1xf32>
    %c0_6 = arith.constant 0 : index
    %c0_7 = arith.constant 0 : index
    %c0_8 = arith.constant 0 : index
    %12 = vector.load %arg4[%c0_6, %c0_7, %c0_8] : memref<1x1x1xf32, #tpu.memory_space<vmem>>, vector<1x1x1xf32>
    tpu.vector_store %arg4[%c0_6, %c0_7, %c0_8], %11 {strides = array<i32>} : memref<1x1x1xf32, #tpu.memory_space<vmem>>, vector<1x1x1xf32>,
    return
  }
  func.func @transform_0(%arg0: i32) -> (i32, i32) {
    %c0_i32 = arith.constant 0 : i32
    %c0_i32_0 = arith.constant 0 : i32
    return %arg0, %c0_i32 : i32, i32
  }
  func.func @transform_1(%arg0: i32) -> (i32, i32) {
    %c0_i32 = arith.constant 0 : i32
    %c0_i32_0 = arith.constant 0 : i32
    %c0_i32_1 = arith.constant 0 : i32
    return %c0_i32, %c0_i32_0 : i32, i32
  }
  func.func @transform_2(%arg0: i32) -> (i32, i32) {
    %c0_i32 = arith.constant 0 : i32
    %c0_i32_0 = arith.constant 0 : i32
    return %arg0, %c0_i32 : i32, i32
  }
  func.func @transform_3(%arg0: i32) -> (i32, i32, i32) {
    %c0_i32 = arith.constant 0 : i32
    %c0_i32_0 = arith.constant 0 : i32
    %c0_i32_1 = arith.constant 0 : i32
    return %arg0, %c0_i32, %c0_i32_0 : i32, i32, i32
  }
}

</mosaic_0001>

<bundles_post_ra>
// kernel: tpu_custom_call.1
= control target key start
LH: loop header
LB: loop body
LE: loop exit
PB: predicated region body
PF: predicated region fallthrough
CT: control target
= control target key end

     0   :  { %s385_s12 = smov 0   ;;  %s424_s0 = inlined_call_operand.vmem [shape: f32[128,128], index: 0, kind: input, shape index: {}]   ;;  %s425_s1 = inlined_call_operand.vmem [shape: f32[1,128], index: 1, kind: input, shape index: {}]   ;;  %s426_s2 = inlined_call_operand.vmem [shape: f32[128,1], index: 2, kind: input, shape index: {}]   ;;  %s427_s3 = inlined_call_operand.vmem [shape: f32[2,1,1], index: 3, kind: output, shape index: {}]  }
   0x1 LB: > { %s391_s13 = sadd.s32 4294967295, %s363_s12   ;;  %p341_p0 = scmp.ge.s32.totalorder %s363_s12, 1  ;;  %s363_s12 = sphi %s385_s12, %s13_s12  }
   0x2   : > { %p149_p1 = scmp.lt.s32.totalorder %s363_s12, 3 }
   0x4   : > { %p150_p2 = pnand %p341_p0, %p149_p1 }
   0x5   : > { %s342_s14 = sshll.u32 (!%p150_p2), %s391_s13, 3  ;;  %v346_v0 = vld [vmem:[%s425_s1] ss:$0 sm:$0xff] (!%p150_p2)  ;;  %vm254_vm0 = vcmask (!%p150_p2), 7168   ;;  %p188_p4 = scmp.lt.s32.totalorder (!%p150_p2), %s391_s13, 1  ;;  %vm276_vm1 = vcmask (!%p150_p2), 0  }
   0x6   : > { %153 = sbr.rel (%p150_p2) target bundleno = 197 (0xc5), region = 32  ;;  %p177_p3 = scmp.lt.s32.totalorder (!%p150_p2), %s342_s14, 15 }
   0xd   : > { %s429_s14 = smov (!%p177_p3, %s342_s14), 15  ;;  %s431_s13 = smov (!%p188_p4, %s391_s13), 1 }
   0xe   : > { %s343_s15 = sshll.u32 %s429_s14, 3  ;;  %s190_s26 = scalar_lea.vmem %s427_s3, %s431_s13 }
   0xf   : > { %s180_s20 = scalar_lea.vmem %s424_s0, %s343_s15  ;;  %s186_s23 = scalar_lea.vmem %s426_s2, %s343_s15 }
  0x10   : > { %v191_v1 = vld [vmem:[%s180_s20] sm:$0xff]  ;;  %v193_v2 = vld [vmem:[%s180_s20 + $0x10] sm:$0xff]  ;;  %v192_v3 = vld [vmem:[%s180_s20 + $0x8] sm:$0xff] }
  0x11   : > { %v206_v4 = vmul.f32 %v346_v0, %v191_v1  ;;  %v208_v5 = vmul.f32 %v346_v0, %v193_v2  ;;  %v194_v6 = vld [vmem:[%s180_s20 + $0x18] sm:$0xff]  ;;  %v207_v7 = vmul.f32 %v346_v0, %v192_v3  ;;  %v195_v9 = vld [vmem:[%s180_s20 + $0x20] sm:$0xff]  ;;  %v196_v10 = vld [vmem:[%s180_s20 + $0x28] sm:$0xff] }
  0x12   : > { %v209_v8 = vmul.f32 %v346_v0, %v194_v6  ;;  %v210_v11 = vmul.f32 %v346_v0, %v195_v9  ;;  %v211_v12 = vmul.f32 %v346_v0, %v196_v10  ;;  %v197_v13 = vld [vmem:[%s180_s20 + $0x30] sm:$0xff]  ;;  %v198_v14 = vld [vmem:[%s180_s20 + $0x38] sm:$0xff]  ;;  %v230_v17 = vld [vmem:[%s186_s23] sm:$0xff] }
  0x13   : > { %214 = vadd.xlane.f32.xlu0 %v206_v4  ;;  %218 = vadd.xlane.f32.xlu1 %v208_v5  ;;  %v212_v15 = vmul.f32 %v346_v0, %v197_v13  ;;  %v213_v16 = vmul.f32 %v346_v0, %v198_v14  ;;  %v232_v19 = vld [vmem:[%s186_s23 + $0x10] sm:$0xff]  ;;  %v231_v22 = vld [vmem:[%s186_s23 + $0x8] sm:$0xff]  ;;  %v233_v23 = vld [vmem:[%s186_s23 + $0x18] sm:$0xff] }
  0x14   : > { %v234_v30 = vld [vmem:[%s186_s23 + $0x20] sm:$0xff]  ;;  %v235_v31 = vld [vmem:[%s186_s23 + $0x28] sm:$0xff]  ;;  %v236_v42 = vld [vmem:[%s186_s23 + $0x30] sm:$0xff] }
  0x15   : > { %v237_v43 = vld [vmem:[%s186_s23 + $0x38] sm:$0xff] }
  0x17   : > { %216 = vadd.xlane.f32.xlu0 %v207_v7  ;;  %220 = vadd.xlane.f32.xlu1 %v209_v8 }
  0x1b   : > { %222 = vadd.xlane.f32.xlu0 %v210_v11  ;;  %224 = vadd.xlane.f32.xlu1 %v211_v12 }
  0x1f   : > { %226 = vadd.xlane.f32.xlu0 %v212_v15  ;;  %228 = vadd.xlane.f32.xlu1 %v213_v16 }
  0xa0   : > { %v215_v18 = vpop.xlane.xlu0 %214  ;;  %v219_v20 = vpop.xlane.xlu1 %218 }
  0xa1   : > { %v238_v21 = vsub.f32 %v215_v18, %v230_v17  ;;  %v240_v24 = vsub.f32 %v219_v20, %v232_v19 }
  0xa3   : > { %v246_v27 = vmul.f32 %v238_v21, %v238_v21  ;;  %v248_v32 = vmul.f32 %v240_v24, %v240_v24 }
  0xa4   : > { %v217_v25 = vpop.xlane.xlu0 %216  ;;  %v221_v26 = vpop.xlane.xlu1 %220 }
  0xa5   : > { %v239_v28 = vsub.f32 %v217_v25, %v231_v22  ;;  %v241_v29 = vsub.f32 %v221_v26, %v233_v23  ;;  %v255_v37 = vsel %vm254_vm0, %v246_v27, 0.0  ;;  %v258_v44 = vsel %vm254_vm0, %v248_v32, 0.0 }
  0xa7   : > { %v247_v33 = vmul.f32 %v239_v28, %v239_v28  ;;  %v249_v34 = vmul.f32 %v241_v29, %v241_v29 }
  0xa8   : > { %v223_v35 = vpop.xlane.xlu0 %222  ;;  %v225_v36 = vpop.xlane.xlu1 %224 }
  0xa9   : > { %v256_v38 = vsel %vm254_vm0, %v247_v33, 0.0  ;;  %v242_v39 = vsub.f32 %v223_v35, %v234_v30  ;;  %v243_v40 = vsub.f32 %v225_v36, %v235_v31  ;;  %v260_v45 = vsel %vm254_vm0, %v249_v34, 0.0 }
  0xaa   : > { %v257_v41 = vadd.f32 %v256_v38, %v255_v37 }
  0xab   : > { %v250_v46 = vmul.f32 %v242_v39, %v242_v39  ;;  %v251_v47 = vmul.f32 %v243_v40, %v243_v40 }
  0xac   : > { %v259_v48 = vadd.f32 %v258_v44, %v257_v41  ;;  %v227_v49 = vpop.xlane.xlu0 %226  ;;  %v229_v50 = vpop.xlane.xlu1 %228 }
  0xad   : > { %v262_v51 = vsel %vm254_vm0, %v250_v46, 0.0  ;;  %v244_v52 = vsub.f32 %v227_v49, %v236_v42  ;;  %v245_v53 = vsub.f32 %v229_v50, %v237_v43  ;;  %v264_v55 = vsel %vm254_vm0, %v251_v47, 0.0 }
  0xae   : > { %v261_v54 = vadd.f32 %v260_v45, %v259_v48 }
  0xaf   : > { %v252_v56 = vmul.f32 %v244_v52, %v244_v52  ;;  %v253_v57 = vmul.f32 %v245_v53, %v245_v53 }
  0xb0   : > { %v263_v58 = vadd.f32 %v262_v51, %v261_v54 }
  0xb1   : > { %v266_v59 = vsel %vm254_vm0, %v252_v56, 0.0  ;;  %v268_v61 = vsel %vm254_vm0, %v253_v57, 0.0 }
  0xb2   : > { %v265_v60 = vadd.f32 %v264_v55, %v263_v58 }
  0xb4   : > { %v267_v62 = vadd.f32 %v266_v59, %v265_v60 }
  0xb6   : > { %v269_v63 = vadd.f32 %v268_v61, %v267_v62 }
  0xb8   : > { %v270_v0 = vrot.slane %v269_v63, 4 }
  0xba   : > { %v271_v1 = vadd.f32 %v270_v0, %v269_v63 }
  0xbc   : > { %v272_v2 = vrot.slane %v271_v1, 2 }
  0xbe   : > { %v273_v3 = vadd.f32 %v272_v2, %v271_v1 }
  0xc0   : > { %v274_v4 = vrot.slane %v273_v3, 1 }
  0xc2   : > { %v275_v5 = vadd.f32 %v274_v4, %v273_v3 }
  0xc4   : > { %277 = vst.msk [vmem:[%s190_s26] sm:$0x1] %vm276_vm1, %v275_v5 }
  0xc5 PF: > { %s13_s12 = sadd.s32 1, %s363_s12  }
  0xc6   : > { %p10_p5 = scmp.ge.s32.totalorder %s13_s12, 4  }
  0xc8   :  { %12 = sbr.rel (!%p10_p5) target bundleno = 1 (0x1), region = 65 }

</bundles_post_ra>
